<compile_context>
chip_gen: v6e
topology: v6e:2x2x1
jax: 0.10.0
libtpu: 0.0.40
codegen_flags: <defaults>
</compile_context>

<pallas_src>
import jax
import jax.numpy as jnp
from jax.experimental import pallas as pl
from jax.experimental.pallas import tpu as pltpu


def _round_up(a, b):
    return ((a + b - 1) // b) * b


def _make_ffn_kernel(num_layers, has_bias, use_layer_norm, use_residual, ln_eps):
    """Build the fused FFN kernel body.

    Ref order: x_ref, [ln_gamma, ln_beta,] then per layer: w_t, [b,], then o_ref.
    """

    def kernel(*refs):
        idx = 0
        x_ref = refs[idx]; idx += 1
        if use_layer_norm:
            gamma_ref = refs[idx]
            beta_ref = refs[idx + 1]
            idx += 2
        w_refs = []
        b_refs = []
        for layer in range(num_layers):
            w_refs.append(refs[idx]); idx += 1
            if has_bias[layer]:
                b_refs.append(refs[idx]); idx += 1
            else:
                b_refs.append(None)
        o_ref = refs[idx]

        if use_layer_norm:
            xf = x_ref[...].astype(jnp.float32)
            mean = jnp.mean(xf, axis=-1, keepdims=True)
            var = jnp.mean(jnp.square(xf - mean), axis=-1, keepdims=True)
            h = (xf - mean) * jax.lax.rsqrt(var + ln_eps)
            h = (h * gamma_ref[...].astype(jnp.float32)
                 + beta_ref[...].astype(jnp.float32))
        else:
            h = x_ref[...]

        for layer in range(num_layers):
            w = w_refs[layer][...]                      # (D_in_p, D_out_p) native dtype
            # Matmul in the parameter dtype (bf16 runs at native MXU rate),
            # accumulate in f32; bias/swish math stays f32.
            acc = jnp.dot(h.astype(w.dtype), w,
                          preferred_element_type=jnp.float32)
            if b_refs[layer] is not None:
                acc = acc + b_refs[layer][...].astype(jnp.float32)
            if layer < num_layers - 1:
                acc = acc * jax.nn.sigmoid(acc)         # swish (EUP sigmoid)
            h = acc

        if use_residual:
            # Re-read x only now so the residual copy is not live across the
            # whole matmul chain (lower vreg/VMEM pressure).
            h = h + x_ref[...].astype(jnp.float32)

        o_ref[...] = h.astype(o_ref.dtype)

    return kernel


def positionwise_feed_forward(
    x,
    weights,
    biases,
    *,
    ln_gamma=None,
    ln_beta=None,
    layer_norm=False,
    residual=False,
    reshape=False,
    block_rows=None,
    ln_eps=1e-5,
    vmem_budget_bytes=40 * 1024 * 1024,
):
    """Pallas equivalent of PositionwiseFeedForward.forward (eval mode).

    x:          (B, L, dims[0])
    weights[i]: Conv1d(dims[i], dims[i+1], 1) weight, (dims[i+1], dims[i][, 1])
    biases[i]:  (dims[i+1],) or None (use_bias=False)
    """
    B, L, D0 = x.shape
    num_layers = len(weights)
    dims = [D0] + [int(w.shape[0]) for w in weights]
    D_out = dims[-1]
    use_residual = bool(residual) and (dims[0] == dims[-1])

    N = B * L
    x2 = x.reshape(N, D0)
    x_itemsize = jnp.dtype(x.dtype).itemsize
    row_align = max(8, 32 // max(1, x_itemsize))   # sublane packing: f32->8, bf16->16

    # ---- Pad feature dims to lane width (128) once, on the params only. ----
    # Input dim D0 stays as-is (padding it would require touching x in HBM).
    # The final output dim is padded only when no residual is applied, so the
    # residual add needs no in-kernel data movement.
    pad_dims = [D0]
    for li in range(1, num_layers + 1):
        d = dims[li]
        if li == num_layers and use_residual:
            pad_dims.append(d)
        else:
            pad_dims.append(_round_up(d, 128))
    D_out_p = pad_dims[-1]
    if use_residual:
        assert D_out_p == D0

    w_list, b_list, has_bias = [], [], []
    for li, (w, b) in enumerate(zip(weights, biases)):
        d_o, d_in = int(w.shape[0]), int(w.shape[1])
        d_in_p, d_o_p = pad_dims[li], pad_dims[li + 1]
        w_t = jnp.asarray(w).reshape(d_o, d_in).T          # (d_in, d_o), lane-dense out
        if (d_in_p, d_o_p) != (d_in, d_o):
            w_t = jnp.pad(w_t, ((0, d_in_p - d_in), (0, d_o_p - d_o)))
        w_list.append(w_t)
        if b is None:
            b_list.append(None)
            has_bias.append(False)
        else:
            b_row = jnp.asarray(b).reshape(1, d_o)
            if d_o_p != d_o:
                b_row = jnp.pad(b_row, ((0, 0), (0, d_o_p - d_o)))
            b_list.append(b_row)
            has_bias.append(True)

    # ---- VMEM-budgeted row tile selection. ----
    param_bytes = 0
    for li in range(num_layers):
        param_bytes += pad_dims[li] * pad_dims[li + 1] * jnp.dtype(w_list[li].dtype).itemsize
        if has_bias[li]:
            param_bytes += pad_dims[li + 1] * jnp.dtype(b_list[li].dtype).itemsize
    if layer_norm:
        param_bytes += 2 * D0 * x_itemsize

    max_pad = max(pad_dims)
    act_bytes_per_row = (2 * D0 * x_itemsize        # double-buffered x tile
                         + 2 * D_out_p * x_itemsize  # double-buffered out tile
                         + 2 * 4 * max_pad)          # f32 intermediates (h + acc)

    if block_rows is None:
        avail = max(vmem_budget_bytes - param_bytes, row_align * act_bytes_per_row)
        TM = row_align
        for cand in (1024, 768, 512, 384, 256, 128, 64, 32, 16, 8):
            if cand * act_bytes_per_row <= avail:
                TM = cand
                break
    else:
        TM = int(block_rows)
    TM = max(row_align, _round_up(TM, row_align))
    TM = min(TM, _round_up(N, row_align))
    # Megacore (v7x): keep >= 2 grid steps when there is enough work so the
    # "parallel" grid axis can shard across both TensorCores.
    if N > row_align and pl.cdiv(N, TM) < 2:
        TM = max(row_align, _round_up(-(-N // 2), row_align))
    grid = (pl.cdiv(N, TM),)

    # ---- Specs / args (no host-side pad of x, no out[:N] slice). ----
    args = [x2]
    in_specs = [pl.BlockSpec((TM, D0), lambda i: (i, 0))]

    def _const_spec(shape):
        # Constant block index: single buffer, stays resident across the grid.
        return pl.BlockSpec(shape, lambda i: (0, 0), pipeline_mode=pl.Buffered(1))

    if layer_norm:
        args += [jnp.asarray(ln_gamma).reshape(1, D0),
                 jnp.asarray(ln_beta).reshape(1, D0)]
        in_specs += [_const_spec((1, D0)), _const_spec((1, D0))]

    for li in range(num_layers):
        args.append(w_list[li])
        in_specs.append(_const_spec((pad_dims[li], pad_dims[li + 1])))
        if has_bias[li]:
            args.append(b_list[li])
            in_specs.append(_const_spec((1, pad_dims[li + 1])))

    kernel = _make_ffn_kernel(num_layers, tuple(has_bias), bool(layer_norm),
                              use_residual, ln_eps)

    flops = 2 * N * sum(pad_dims[i] * pad_dims[i + 1] for i in range(num_layers))
    transcendentals = N * sum(pad_dims[1:-1])
    bytes_accessed = N * D0 * x_itemsize + N * D_out_p * x_itemsize + param_bytes

    est_vmem = param_bytes + TM * act_bytes_per_row
    vmem_limit = int(min(56 << 20, max(est_vmem + (8 << 20), 32 << 20)))

    out = pl.pallas_call(
        kernel,
        out_shape=jax.ShapeDtypeStruct((N, D_out_p), x.dtype),
        grid_spec=pltpu.PrefetchScalarGridSpec(
            num_scalar_prefetch=0,
            grid=grid,
            in_specs=in_specs,
            out_specs=pl.BlockSpec((TM, D_out_p), lambda i: (i, 0)),
        ),
        compiler_params=pltpu.CompilerParams(
            dimension_semantics=("parallel",),
            vmem_limit_bytes=vmem_limit,
        ),
        cost_estimate=pl.CostEstimate(
            flops=flops,
            transcendentals=transcendentals,
            bytes_accessed=bytes_accessed),
    )(*args)

    if D_out_p != D_out:
        out = out[:, :D_out]
    out = out.reshape(B, L, D_out)
    if reshape:
        out = out.reshape(B, -1, 1)
    return out


def _reference_forward(x, weights, biases, *, ln_gamma=None, ln_beta=None,
                       layer_norm=False, residual=False, ln_eps=1e-5):
    """Pure-JAX reference mirroring the PyTorch forward (eval mode)."""
    h = x.astype(jnp.float32)
    if layer_norm:
        mean = jnp.mean(h, axis=-1, keepdims=True)
        var = jnp.mean(jnp.square(h - mean), axis=-1, keepdims=True)
        h = (h - mean) / jnp.sqrt(var + ln_eps)
        h = (h * jnp.asarray(ln_gamma, jnp.float32)
             + jnp.asarray(ln_beta, jnp.float32))
    n = len(weights)
    for i, (w, b) in enumerate(zip(weights, biases)):
        w2 = jnp.asarray(w).reshape(w.shape[0], w.shape[1]).astype(jnp.float32)
        h = jnp.einsum("bld,od->blo", h, w2)
        if b is not None:
            h = h + jnp.asarray(b).astype(jnp.float32)
        if i < n - 1:
            h = h * jax.nn.sigmoid(h)
    if residual and x.shape[-1] == h.shape[-1]:
        h = h + x.astype(jnp.float32)
    return h.astype(x.dtype)


if __name__ == "__main__":
    key = jax.random.PRNGKey(0)
    k_x, k_w1, k_b1, k_w2, k_b2, k_g, k_bt = jax.random.split(key, 7)

    # Small shapes: batch=2, seq=8, dims = (32, 64, 32)
    B, L = 2, 8
    D0, D1, D2 = 32, 64, 32

    x = jax.random.normal(k_x, (B, L, D0), dtype=jnp.float32)
    w1 = jax.random.normal(k_w1, (D1, D0), dtype=jnp.float32) / jnp.sqrt(D0)
    b1 = 0.1 * jax.random.normal(k_b1, (D1,), dtype=jnp.float32)
    w2 = jax.random.normal(k_w2, (D2, D1), dtype=jnp.float32) / jnp.sqrt(D1)
    b2 = 0.1 * jax.random.normal(k_b2, (D2,), dtype=jnp.float32)
    ln_gamma = 1.0 + 0.1 * jax.random.normal(k_g, (D0,), dtype=jnp.float32)
    ln_beta = 0.1 * jax.random.normal(k_bt, (D0,), dtype=jnp.float32)

    weights = [w1, w2]
    biases = [b1, b2]

    # 1) Default flags (layer_norm=False, residual=False, dropout=None).
    out = jax.block_until_ready(positionwise_feed_forward(x, weights, biases))
    ref = _reference_forward(x, weights, biases)
    assert out.shape == (B, L, D2), out.shape
    assert out.dtype == x.dtype
    assert bool(jnp.allclose(out, ref, atol=2e-2, rtol=2e-2)), "default path mismatch"

    # 2) layer_norm=True, residual=True (dims[0] == dims[-1] so residual applies).
    out2 = jax.block_until_ready(positionwise_feed_forward(
        x, weights, biases, ln_gamma=ln_gamma, ln_beta=ln_beta,
        layer_norm=True, residual=True))
    ref2 = _reference_forward(
        x, weights, biases, ln_gamma=ln_gamma, ln_beta=ln_beta,
        layer_norm=True, residual=True)
    assert out2.shape == (B, L, D2), out2.shape
    assert bool(jnp.allclose(out2, ref2, atol=2e-2, rtol=2e-2)), "ln+residual mismatch"

    # 3) bf16 path (native-rate MXU, no f32 upcast of weights) with one
    #    bias-free layer to exercise the bias-skip path.
    xb = x.astype(jnp.bfloat16)
    wb = [w1.astype(jnp.bfloat16), w2.astype(jnp.bfloat16)]
    bb = [b1.astype(jnp.bfloat16), None]
    out3 = jax.block_until_ready(positionwise_feed_forward(xb, wb, bb))
    ref3 = _reference_forward(xb, wb, bb)
    assert out3.shape == (B, L, D2), out3.shape
    assert out3.dtype == jnp.bfloat16
    assert bool(jnp.allclose(out3.astype(jnp.float32), ref3.astype(jnp.float32),
                             atol=1e-1, rtol=1e-1)), "bf16 path mismatch"

    print("KERNEL_OK")
</pallas_src>

<mosaic_0001>
module attributes {stable_mosaic.version = 11 : i64} {
  func.func @kernel(%arg0: i32, %arg1: memref<8x32xf32, #tpu.memory_space<vmem>>, %arg2: memref<32x128xf32, #tpu.memory_space<vmem>>, %arg3: memref<1x128xf32, #tpu.memory_space<vmem>>, %arg4: memref<128x128xf32, #tpu.memory_space<vmem>>, %arg5: memref<1x128xf32, #tpu.memory_space<vmem>>, %arg6: memref<8x128xf32, #tpu.memory_space<vmem>>) attributes {dimension_semantics = [#tpu.dimension_semantics<parallel>], iteration_bounds = array<i64: 2>, scalar_prefetch = 0 : i64, scratch_operands = 0 : i64, tpu.core_type = #tpu.core_type<tc>, window_params = [{transform_indices = @transform_0, window_bounds = array<i64: 8, 32>}, {pipeline_mode = #tpu.pipeline_mode<synchronous>, transform_indices = @transform_1, window_bounds = array<i64: 32, 128>}, {pipeline_mode = #tpu.pipeline_mode<synchronous>, transform_indices = @transform_2, window_bounds = array<i64: 1, 128>}, {pipeline_mode = #tpu.pipeline_mode<synchronous>, transform_indices = @transform_3, window_bounds = array<i64: 128, 128>}, {pipeline_mode = #tpu.pipeline_mode<synchronous>, transform_indices = @transform_4, window_bounds = array<i64: 1, 128>}, {transform_indices = @transform_5, window_bounds = array<i64: 8, 128>}]} {
    %c0 = arith.constant 0 : index
    %c0_0 = arith.constant 0 : index
    %0 = vector.load %arg1[%c0, %c0_0] : memref<8x32xf32, #tpu.memory_space<vmem>>, vector<8x32xf32>
    %c0_1 = arith.constant 0 : index
    %c0_2 = arith.constant 0 : index
    %1 = vector.load %arg2[%c0_1, %c0_2] : memref<32x128xf32, #tpu.memory_space<vmem>>, vector<32x128xf32>
    %cst = arith.constant dense<0.000000e+00> : vector<8x128xf32>
    %2 = tpu.matmul %0, %1, %cst {dimension_numbers = #tpu.dot_dimension_numbers<[1], [0], [0], [1], [0, 0, 1, 1], [], []>} : vector<8x32xf32>, vector<32x128xf32>, vector<8x128xf32> -> vector<8x128xf32>
    %c0_3 = arith.constant 0 : index
    %c0_4 = arith.constant 0 : index
    %3 = vector.load %arg3[%c0_3, %c0_4] : memref<1x128xf32, #tpu.memory_space<vmem>>, vector<1x128xf32>
    %4 = vector.broadcast %3 : vector<1x128xf32> to vector<8x128xf32>
    %5 = arith.addf %2, %4 : vector<8x128xf32>
    %6 = arith.negf %5 : vector<8x128xf32>
    %7 = math.exp %6 : vector<8x128xf32>
    %cst_5 = arith.constant 1.000000e+00 : f32
    %8 = vector.broadcast %cst_5 : f32 to vector<8x128xf32>
    %9 = arith.addf %8, %7 : vector<8x128xf32>
    %10 = arith.divf %8, %9 : vector<8x128xf32>
    %11 = arith.mulf %5, %10 : vector<8x128xf32>
    %c0_6 = arith.constant 0 : index
    %c0_7 = arith.constant 0 : index
    %12 = vector.load %arg4[%c0_6, %c0_7] : memref<128x128xf32, #tpu.memory_space<vmem>>, vector<128x128xf32>
    %cst_8 = arith.constant dense<0.000000e+00> : vector<8x128xf32>
    %13 = tpu.matmul %11, %12, %cst_8 {dimension_numbers = #tpu.dot_dimension_numbers<[1], [0], [0], [1], [0, 0, 1, 1], [], []>} : vector<8x128xf32>, vector<128x128xf32>, vector<8x128xf32> -> vector<8x128xf32>
    %c0_9 = arith.constant 0 : index
    %c0_10 = arith.constant 0 : index
    %14 = vector.load %arg5[%c0_9, %c0_10] : memref<1x128xf32, #tpu.memory_space<vmem>>, vector<1x128xf32>
    %15 = vector.broadcast %14 : vector<1x128xf32> to vector<8x128xf32>
    %16 = arith.addf %13, %15 : vector<8x128xf32>
    %c0_11 = arith.constant 0 : index
    %c0_12 = arith.constant 0 : index
    %17 = vector.load %arg6[%c0_11, %c0_12] : memref<8x128xf32, #tpu.memory_space<vmem>>, vector<8x128xf32>
    tpu.vector_store %arg6[%c0_11, %c0_12], %16 {strides = array<i32>} : memref<8x128xf32, #tpu.memory_space<vmem>>, vector<8x128xf32>,
    return
  }
  func.func @transform_0(%arg0: i32) -> (i32, i32) {
    %c0_i32 = arith.constant 0 : i32
    %c0_i32_0 = arith.constant 0 : i32
    return %arg0, %c0_i32 : i32, i32
  }
  func.func @transform_1(%arg0: i32) -> (i32, i32) {
    %c0_i32 = arith.constant 0 : i32
    %c0_i32_0 = arith.constant 0 : i32
    %c0_i32_1 = arith.constant 0 : i32
    return %c0_i32, %c0_i32_0 : i32, i32
  }
  func.func @transform_2(%arg0: i32) -> (i32, i32) {
    %c0_i32 = arith.constant 0 : i32
    %c0_i32_0 = arith.constant 0 : i32
    %c0_i32_1 = arith.constant 0 : i32
    return %c0_i32, %c0_i32_0 : i32, i32
  }
  func.func @transform_3(%arg0: i32) -> (i32, i32) {
    %c0_i32 = arith.constant 0 : i32
    %c0_i32_0 = arith.constant 0 : i32
    %c0_i32_1 = arith.constant 0 : i32
    return %c0_i32, %c0_i32_0 : i32, i32
  }
  func.func @transform_4(%arg0: i32) -> (i32, i32) {
    %c0_i32 = arith.constant 0 : i32
    %c0_i32_0 = arith.constant 0 : i32
    %c0_i32_1 = arith.constant 0 : i32
    return %c0_i32, %c0_i32_0 : i32, i32
  }
  func.func @transform_5(%arg0: i32) -> (i32, i32) {
    %c0_i32 = arith.constant 0 : i32
    %c0_i32_0 = arith.constant 0 : i32
    return %arg0, %c0_i32 : i32, i32
  }
}

</mosaic_0001>

<bundles_post_ra>
// kernel: tpu_custom_call.1
= control target key start
LH: loop header
LB: loop body
LE: loop exit
PB: predicated region body
PF: predicated region fallthrough
CT: control target
= control target key end

     0   :  { %10 = vsyncpa [#allocation3], 0  ;;  %s1113_s0 = inlined_call_operand.hbm [shape: f32[16,32], index: 0, kind: input, shape index: {}]   ;;  %s1114_s1 = inlined_call_operand.hbm [shape: f32[32,128], index: 1, kind: input, shape index: {}]   ;;  %s1115_s2 = inlined_call_operand.vmem [shape: f32[1,128], index: 2, kind: input, shape index: {}]   ;;  %s1116_s3 = inlined_call_operand.hbm [shape: f32[128,128], index: 3, kind: input, shape index: {}]   ;;  %s1117_s4 = inlined_call_operand.vmem [shape: f32[1,128], index: 4, kind: input, shape index: {}]   ;;  %s1118_s5 = inlined_call_operand.hbm [shape: f32[16,128], index: 5, kind: output, shape index: {}]  }
   0x1   :  { %12 = vsyncpa [#allocation3 + $0x1], 0 }
   0x2   :  { %13 = vsyncpa [#allocation6], 0 }
   0x3   :  { %14 = vsyncpa [#allocation4], 0 }
   0x4   :  { %16 = vsyncpa [#allocation4 + $0x1], 0  ;;  %s910_s18 = smov 0   ;;  %s912_s19 = smov 0  }
   0x5   :  { %s914_s20 = smov 0   ;;  %s916_s21 = smov 0  }
   0x6 LB: > { %s931_s22 = sadd.s32 4294967295, %s870_s21   ;;  %s559_s23 = sadd.s32 4294967294, %s870_s21   ;;  %s870_s21 = sphi %s916_s21, %s1140_s21   ;;  %s866_s20 = sphi %s914_s20, %s1139_s20   ;;  %s862_s19 = sphi %s912_s19, %s1138_s19   ;;  %s858_s18 = sphi %s910_s18, %s1137_s18  }
   0x7   : > { %p42_p0 = scmp.ne.s32.totalorder %s862_s19, %s858_s18  ;;  %p1119_p1 = scmp.eq.s32.totalorder %s931_s22, 0 }
   0x8   : > { %p156_p3 = scmp.eq.s32.totalorder %s559_s23, 1  ;;  %p560_p5 = scmp.ge.s32.totalorder %s870_s21, 1 }
   0x9   : > { %p940_p4 = por %p1119_p1, %p42_p0  ;;  %p163_p7 = scmp.lt.s32.totalorder %s870_s21, 3 }
   0xa   : > { %p945_p6 = por %p156_p3, %p42_p0  ;;  %s872_s27 = smov [#allocation5]  }
   0xb   : > { %s1123_s24 = scalar_select %p940_p4, 1, 0 }
   0xc   : > { %s1124_s25 = scalar_select %p945_p6, 1, 0 }
   0xd   : > { %p950_p8 = pnand %p560_p5, %p163_p7  ;;  %s175_s28 = sshll.u32 %s872_s27, 4  ;;  %s176_s28 = int_to_ptr.vmem [resolvable:$true] %s175_s28 }
   0xe   : > { %s873_s30 = smov [#allocation7]   ;;  %s733_s7 = scalar_lea.vmem %s176_s28, 512 }
   0xf   : > { %s1125_s26 = scalar_select %p950_p8, 1, 0 }
  0x10   : > { %p659_p9 = pneg %p950_p8  ;;  %s191_s6 = sshll.u32 %s873_s30, 4  ;;  %s192_s6 = int_to_ptr.vmem [resolvable:$true] %s191_s6 }
  0x11   : > { %p734_p13 = scmp.ne.s32.totalorder %s176_s28, %s733_s7  ;;  %p741_p5 = scmp.lt.s32.totalorder %s176_s28, %s176_s28 }
  0x12   : > { %p959_p11 = pnand %p659_p9, %p1119_p1  ;;  %p742_p7 = scmp.lt.s32.totalorder %s733_s7, %s733_s7 }
  0x14   : > { %p724_p12 = pneg %p959_p11  ;;  %p743_p10 = por %p742_p7, %p741_p5 }
  0x16   : > { %p736_p0 = pnand %p734_p13, %p724_p12 }
  0x18   : > { %p737_p3 = pneg %p736_p0 }
  0x1a   : > { %p744_p9 = pnand %p743_p10, %p737_p3 }
  0x1c   : > { %747 = shalt.err (!%p744_p9)
}
  0x1d   : > { %s874_s8 = smov 128   ;;  %s875_s9 = smov 8  }
  0x1e   : > { %662 = dma.hbm_to_vmem [thread:$0]  (!%p959_p11), %s1114_s1, 512, %s176_s28, [#allocation6], %s874_s8, %s874_s8, %s875_s9  }
  0x1f   : > { %s759_s12 = scalar_lea.vmem %s192_s6, 2048  ;;  %p767_p2 = scmp.lt.s32.totalorder %s192_s6, %s192_s6 }
  0x20   : > { %p760_p1 = scmp.ne.s32.totalorder %s192_s6, %s759_s12  ;;  %p768_p6 = scmp.lt.s32.totalorder %s759_s12, %s759_s12 }
  0x22   : > { %p762_p13 = pnand %p760_p1, %p724_p12  ;;  %p769_p5 = por %p768_p6, %p767_p2 }
  0x24   : > { %p763_p0 = pneg %p762_p13 }
  0x26   : > { %p770_p10 = pnand %p769_p5, %p763_p0 }
  0x28   : > { %773 = shalt.err (!%p770_p10)
}
  0x29   : > { %665 = dma.hbm_to_vmem [thread:$0]  (!%p959_p11), %s1116_s3, 2048, %s192_s6, [#allocation6], %s874_s8, %s874_s8, %s875_s9  }
  0x2a   : > { %s982_s15 = sadd.s32 1, %s870_s21   ;;  %s29_s16 = sadd.s32 1, %s866_s20 }
  0x2b   : > { %s26_s17 = ssub.s32 %s870_s21, %s982_s15  ;;  %p36_p1 = scmp.ne.s32.totalorder %s866_s20, %s862_s19 }
  0x2c   : > { %p27_p2 = scmp.eq.s32.totalorder %s26_s17, 0  ;;  %p37_p6 = scmp.eq.s32.totalorder %s870_s21, 0 }
  0x2d   : > { %p1127_p12 = scmp.eq.s32.totalorder %s931_s22, 1  ;;  %p676_p7 = scmp.lt.s32.totalorder %s870_s21, 2 }
  0x2e   : > { %s998_s27 = scalar_select %p27_p2, %s866_s20, %s29_s16  }
  0x2f   : > { %p992_p3 = por %p1127_p12, %p36_p1  ;;  %p38_p9 = por %p37_p6, %p36_p1 }
  0x30   : > { %s208_s28 = sand.u32 1, %s866_s20   ;;  %s565_s30 = sshll.u32 %s870_s21, 7 }
  0x31   : > { %s1128_s23 = scalar_select %p992_p3, 1, 0 }
  0x32   : > { %s564_s29 = sshll.u32 %s208_s28, 3  ;;  %s1005_s8 = scalar_lea.hbm %s1113_s0, %s565_s30 }
  0x33   : > { %s212_s9 = scalar_lea.vmem [#allocation2], %s564_s29  ;;  %p1007_p11 = pnand %p676_p7, %p38_p9 }
  0x34   : > { %s219_s10 = sshll.u32 %s212_s9, 4  ;;  %s209_s12 = scalar_lea.sflag [#allocation3], %s208_s28  ;;  %s220_s10 = int_to_ptr.vmem [resolvable:$true] %s219_s10 }
  0x35   : > { %s774_s13 = scalar_lea.hbm %s1005_s8, 128  ;;  %p776_p0 = pneg %p1007_p11 }
  0x36   : > { %p775_p13 = scmp.ne.s32.totalorder %s1005_s8, %s774_s13  ;;  %s779_s17 = scalar_lea.hbm %s1113_s0, 256 }
  0x37   : > { %p780_p1 = scmp.lt.s32.totalorder %s1005_s8, %s1113_s0  ;;  %p781_p2 = scmp.lt.s32.totalorder %s779_s17, %s774_s13 }
  0x38   : > { %p777_p5 = pnand %p776_p0, %p775_p13 }
  0x39   : > { %p782_p6 = por %p781_p2, %p780_p1 }
  0x3a   : > { %p778_p10 = pneg %p777_p5 }
  0x3c   : > { %p783_p12 = pnand %p782_p6, %p778_p10 }
  0x3e   : > { %786 = shalt.err (!%p783_p12)
}
  0x3f   : > { %s787_s6 = scalar_lea.vmem %s220_s10, 128  ;;  %s876_s28 = smov [#allocation2]  }
  0x40   : > { %p788_p7 = scmp.ne.s32.totalorder %s220_s10, %s787_s6  ;;  %s792_s7 = sshll.u32 %s876_s28, 4  ;;  %s793_s7 = int_to_ptr.vmem [resolvable:$false] %s792_s7 }
  0x41   : > { %s794_s9 = scalar_lea.vmem %s793_s7, 256  ;;  %p795_p13 = scmp.lt.s32.totalorder %s220_s10, %s793_s7 }
  0x42   : > { %p790_p9 = pnand %p788_p7, %p776_p0  ;;  %p796_p5 = scmp.lt.s32.totalorder %s794_s9, %s787_s6 }
  0x44   : > { %p791_p3 = pneg %p790_p9  ;;  %p797_p4 = por %p796_p5, %p795_p13 }
  0x46   : > { %p798_p8 = pnand %p797_p4, %p791_p3 }
  0x48   : > { %801 = shalt.err (!%p798_p8)
}
  0x49   : > { %669 = dma.hbm_to_vmem [thread:$0]  (!%p1007_p11), %s1005_s8, 128, %s220_s10, %s209_s12  }
  0x4a   : > { %p1130_p10 = scmp.ne.s32.totalorder %s1125_s26, 0 }
  0x4b   : > { %s1028_s13 = sand.u32 (!%p1130_p10), 1, %s862_s19   ;;  %p1131_p4 = scmp.ne.s32.totalorder (!%p1130_p10), %s1123_s24, 0 }
  0x4c   : > { %228 = sbr.rel (%p1130_p10) target bundleno = 532 (0x214), region = 40  ;;  %s567_s14 = sshll.u32 (!%p1130_p10), %s1028_s13, 3 }
  0x4d   : > { %s231_s16 = scalar_lea.sflag (!%p1130_p10), [#allocation3], %s1028_s13  ;;  %s234_s17 = scalar_lea.vmem (!%p1130_p10), [#allocation2], %s567_s14 }
  0x51   : > { %845 = dma.done.wait (%p1131_p4), %s231_s16, 128  }
  0x52   : > { %847 = vsyncadd (%p1131_p4), %s231_s16, 4294967168  ;;  %p1132_p8 = scmp.eq.s32.totalorder %s931_s22, 0 }
  0x54   : > { %849 = dma.done.wait (%p1132_p8), [#allocation6], 2560   ;;  %p1133_p3 = pmov %p1132_p8 }
  0x55   : > { %v877_v0 = vmov 0.0   ;;  %vm878_vm0 = vmmov 0   ;;  %v273_v1 = vld [vmem:[#allocation5 + $0x18] sm:$0xff]  ;;  %v272_v2 = vld [vmem:[#allocation5 + $0x10] sm:$0xff]  ;;  %v271_v3 = vld [vmem:[#allocation5 + $0x8] sm:$0xff]  ;;  %vm281_vm1 = vcmask 261120  }
  0x56   : > { %851 = vsyncadd (%p1133_p3), [#allocation6], 4294964736  ;;  %601 = vmatprep.subr.mxu0 %v877_v0  ;;  %609 = vmatprep.mubr.msk.f32.mxu0 %vm878_vm0, %v877_v0  ;;  %v270_v4 = vld [vmem:[#allocation5] sm:$0xff]  ;;  %v269_v5 = vld [vmem:[%s234_s17] sm:$0xff]  ;;  %s576_s11 = sshll.u32 %s931_s22, 7  ;;  %s268_s12 = scalar_lea.vmem [#allocation8], %s567_s14 }
  0x57   : > { %612 = vmatprep.subr.mxu1 %v877_v0  ;;  %644 = vmatprep.mubr.msk.f32.mxu1 %vm878_vm0, %v877_v0  ;;  %v377_v6 = vld [vmem:[#allocation7 + $0x78] sm:$0xff]  ;;  %v376_v7 = vld [vmem:[#allocation7 + $0x70] sm:$0xff]  ;;  %v375_v8 = vld [vmem:[#allocation7 + $0x68] sm:$0xff]  ;;  %s470_s30 = sshll.u32 %s268_s12, 4  ;;  %s1076_s28 = scalar_lea.hbm %s1118_s5, %s576_s11  ;;  %s471_s30 = int_to_ptr.vmem [resolvable:$true] %s470_s30 }
  0x58   : > { %602 = vmatpush3.msra.mxu0 %v273_v1  ;;  %613 = vmatpush3.msra.mxu1 %v377_v6  ;;  %v374_v9 = vld [vmem:[#allocation7 + $0x60] sm:$0xff]  ;;  %v373_v10 = vld [vmem:[#allocation7 + $0x58] sm:$0xff]  ;;  %v372_v11 = vld [vmem:[#allocation7 + $0x50] sm:$0xff]  ;;  %s457_s7 = scalar_lea.sflag [#allocation4], %s1028_s13  ;;  %s802_s9 = scalar_lea.vmem %s471_s30, 128 }
  0x59   : > { %603 = vmatprep.subr.mxu0 %v877_v0  ;;  %614 = vmatprep.subr.mxu1 %v877_v0  ;;  %v371_v12 = vld [vmem:[#allocation7 + $0x48] sm:$0xff]  ;;  %v370_v13 = vld [vmem:[#allocation7 + $0x40] sm:$0xff]  ;;  %v369_v14 = vld [vmem:[#allocation7 + $0x38] sm:$0xff]  ;;  %p803_p11 = scmp.ne.s32.totalorder %s471_s30, %s802_s9  ;;  %p1134_p0 = scmp.ne.s32.totalorder %s1128_s23, 0 }
  0x5a   : > { %604 = vmatpush3.msra.mxu0 %v272_v2  ;;  %615 = vmatpush3.msra.mxu1 %v376_v7  ;;  %v368_v15 = vld [vmem:[#allocation7 + $0x30] sm:$0xff]  ;;  %v367_v16 = vld [vmem:[#allocation7 + $0x28] sm:$0xff]  ;;  %v366_v17 = vld [vmem:[#allocation7 + $0x20] sm:$0xff]  ;;  %s879_s22 = smov [#allocation8]  }
  0x5b   : > { %605 = vmatprep.subr.mxu0 %v877_v0  ;;  %616 = vmatprep.subr.mxu1 %v877_v0  ;;  %v365_v18 = vld [vmem:[#allocation7 + $0x18] sm:$0xff]  ;;  %v364_v19 = vld [vmem:[#allocation7 + $0x10] sm:$0xff]  ;;  %v363_v20 = vld [vmem:[#allocation7 + $0x8] sm:$0xff]  ;;  %p804_p1 = pnand %p803_p11, %p1134_p0  ;;  %s806_s16 = sshll.u32 %s879_s22, 4  ;;  %s807_s16 = int_to_ptr.vmem [resolvable:$false] %s806_s16 }
  0x5c   : > { %606 = vmatpush3.msra.mxu0 %v271_v3  ;;  %617 = vmatpush3.msra.mxu1 %v375_v8  ;;  %v362_v21 = vld [vmem:[#allocation7] sm:$0xff]  ;;  %v571_v22 = vld [vmem:[%s1115_s2] ss:$0 sm:$0xff]  ;;  %s808_s14 = scalar_lea.vmem %s807_s16, 256  ;;  %p809_p6 = scmp.lt.s32.totalorder %s471_s30, %s807_s16 }
  0x5d   : > { %607 = vmatprep.subr.mxu0 %v877_v0  ;;  %618 = vmatprep.subr.mxu1 %v877_v0  ;;  %v574_v31 = vld [vmem:[%s1117_s4] ss:$0 sm:$0xff]  ;;  %p805_p2 = pneg %p804_p1  ;;  %p810_p12 = scmp.lt.s32.totalorder %s808_s14, %s802_s9 }
  0x5e   : > { %608 = vmatpush3.msra.mxu0 %v270_v4  ;;  %619 = vmatpush3.msra.mxu1 %v374_v9 }
  0x5f   : > { %610 = vmatmul.mubr.msk.f32.vlgmr.msra.gmra.mxu0 %vm281_vm1, %v269_v5  ;;  %620 = vmatprep.subr.mxu1 %v877_v0  ;;  %p811_p7 = por %p810_p12, %p809_p6 }
  0x60   : > { %621 = vmatpush3.msra.mxu1 %v373_v10 }
  0x61   : > { %622 = vmatprep.subr.mxu1 %v877_v0  ;;  %p812_p9 = pnand %p811_p7, %p805_p2 }
  0x62   : > { %623 = vmatpush3.msra.mxu1 %v372_v11 }
  0x63   : > { %624 = vmatprep.subr.mxu1 %v877_v0 }
  0x64   : > { %625 = vmatpush3.msra.mxu1 %v371_v12 }
  0x65   : > { %626 = vmatprep.subr.mxu1 %v877_v0 }
  0x66   : > { %627 = vmatpush3.msra.mxu1 %v370_v13 }
  0x67   : > { %628 = vmatprep.subr.mxu1 %v877_v0 }
  0x68   : > { %629 = vmatpush3.msra.mxu1 %v369_v14 }
  0x69   : > { %630 = vmatprep.subr.mxu1 %v877_v0 }
  0x6a   : > { %631 = vmatpush3.msra.mxu1 %v368_v15 }
  0x6b   : > { %632 = vmatprep.subr.mxu1 %v877_v0 }
  0x6c   : > { %633 = vmatpush3.msra.mxu1 %v367_v16 }
  0x6d   : > { %634 = vmatprep.subr.mxu1 %v877_v0 }
  0x6e   : > { %635 = vmatpush3.msra.mxu1 %v366_v17 }
  0x6f   : > { %636 = vmatprep.subr.mxu1 %v877_v0 }
  0x70   : > { %637 = vmatpush3.msra.mxu1 %v365_v18 }
  0x71   : > { %638 = vmatprep.subr.mxu1 %v877_v0 }
  0x72   : > { %639 = vmatpush3.msra.mxu1 %v364_v19 }
  0x73   : > { %640 = vmatprep.subr.mxu1 %v877_v0 }
  0x74   : > { %641 = vmatpush3.msra.mxu1 %v363_v20 }
  0x75   : > { %642 = vmatprep.subr.mxu1 %v877_v0 }
  0x76   : > { %643 = vmatpush3.msra.mxu1 %v362_v21 }
 0x11f   : > { %v351_v23 = vpop.f32.mrf.mxu0 }
 0x120   : > { %v352_v24 = vadd.f32 %v571_v22, %v351_v23 }
 0x121   : > { %v611_v25 = vpop.f32.mrf.mxu0 }
 0x122   : > { %v573_v26 = vmul.f32 -1.442695, %v352_v24 }
 0x124   : > { %718 = vpow2.f32 %v573_v26 }
 0x131   : > { %v719_v27 = vpop.eup %718 }
 0x132   : > { %v358_v28 = vadd.f32 1.0, %v719_v27 }
 0x134   : > { %720 = vrcp.f32 %v358_v28 }
 0x141   : > { %v721_v29 = vpop.eup %720 }
 0x142   : > { %v361_v30 = vmul.f32 %v721_v29, %v352_v24 }
 0x144   : > { %645 = vmatmul.mubr.f32.vlgmr.msra.gmra.mxu1 %v361_v30 }
 0x204   : > { %v451_v32 = vpop.f32.mrf.mxu1 }
 0x205   : > { %v452_v33 = vadd.f32 %v574_v31, %v451_v32 }
 0x206   : > { %v646_v34 = vpop.f32.mrf.mxu1 }
 0x207   : > { %455 = vst [vmem:[%s268_s12] sm:$0xff] %v452_v33 }
 0x208   : > { %815 = shalt.err (!%p812_p9)
}
 0x209   : > { %s816_s17 = scalar_lea.hbm %s1076_s28, 128  ;;  %s820_s26 = scalar_lea.hbm %s1118_s5, 256 }
 0x20a   : > { %p817_p13 = scmp.ne.s32.totalorder %s1076_s28, %s816_s17  ;;  %p821_p4 = scmp.lt.s32.totalorder %s1076_s28, %s1118_s5 }
 0x20b   : > { %p822_p8 = scmp.lt.s32.totalorder %s820_s26, %s816_s17 }
 0x20c   : > { %p818_p5 = pnand %p817_p13, %p1134_p0 }
 0x20d   : > { %p823_p3 = por %p822_p8, %p821_p4 }
 0x20e   : > { %p819_p10 = pneg %p818_p5 }
 0x210   : > { %p824_p11 = pnand %p823_p3, %p819_p10 }
 0x212   : > { %827 = shalt.err (!%p824_p11)
}
 0x213   : > { %657 = dma.vmem_to_hbm [thread:$0]  (%p1134_p0), %s471_s30, 128, %s1076_s28, %s457_s7  }
 0x214 PF: > { %s482_s11 = sand.u32 1, %s858_s18   ;;  %p1135_p1 = scmp.ne.s32.totalorder %s1124_s25, 0 }
 0x215   : > { %p1136_p2 = scmp.ge.s32.totalorder %s870_s21, 2  ;;  %s483_s12 = scalar_lea.sflag [#allocation4], %s482_s11 }
 0x217   : > { %p671_p6 = pnand %p1136_p2, %p1135_p1 }
 0x219   : > { %p672_p12 = pneg %p671_p6 }
 0x21b   : > { %853 = dma.done.wait (%p672_p12), %s483_s12, 128  }
 0x21c   : > { %855 = vsyncadd (%p672_p12), %s483_s12, 4294967168  ;;  %p19_p7 = scmp.ge.s32.totalorder %s982_s15, 4   ;;  %s1137_s18 = smov %s862_s19 }
 0x21d   : > { %s1138_s19 = smov %s866_s20  ;;  %s1139_s20 = smov %s998_s27 }
 0x21e   : > { %s1140_s21 = smov %s982_s15  ;;  %21 = sbr.rel (!%p19_p7) target bundleno = 6 (0x6), region = 93 }
 0x223   :  { %488 = vsyncpa [#allocation3], 1 }
 0x224   :  { %490 = vsyncpa [#allocation3 + $0x1], 1 }
 0x225   :  { %491 = vsyncpa [#allocation6], 1 }
 0x226   :  { %492 = vsyncpa [#allocation4], 1 }
 0x227   :  { %494 = vsyncpa [#allocation4 + $0x1], 1 }

</bundles_post_ra>
